<compile_context>
chip_gen: v5e
topology: v5e:2x2
jax: 0.10.0
libtpu: 0.0.40
codegen_flags: <defaults>
</compile_context>

<pallas_src>
import functools
import math

import jax
import jax.numpy as jnp
from jax import lax
from jax.experimental import pallas as pl
from jax.experimental.pallas import tpu as pltpu

_F32 = jnp.float32
_BF16 = jnp.bfloat16


def _vmem_cap_bytes():
    """Usable per-kernel VMEM budget for this TPU generation (with headroom)."""
    cap = 64 * 2**20
    try:
        info = pltpu.get_tpu_info()
        cap = int(getattr(info, "vmem_capacity_bytes", cap))
    except Exception:
        pass
    return max(16 * 2**20, cap - 8 * 2**20)


def _pick_block(dim, target, unit):
    """Largest multiple of `unit` dividing `dim` and <= target, else full dim."""
    if dim <= target:
        return dim
    blk = (target // unit) * unit
    while blk >= unit:
        if dim % blk == 0:
            return blk
        blk -= unit
    return dim


# --------------------- dense (x @ W + b): embedding & vocab head -------------

def _dense_kernel(x_ref, w_ref, b_ref, o_ref):
    o_ref[...] = (jnp.dot(x_ref[...].astype(_BF16), w_ref[...],
                          preferred_element_type=_F32) + b_ref[...])


def _dense(x, w, b):
    """(M,K) f32 @ (K,N) bf16 + (1,N) f32 -> (M,N) f32, tiled over rows/cols."""
    M, K = x.shape
    N = w.shape[1]
    rb = _pick_block(M, 512, 8)
    cb = _pick_block(N, 512, 128)
    est = 2 * (rb * K * 4 + K * cb * 2 + cb * 4 + rb * cb * 4) + rb * cb * 4
    vmem = int(min(_vmem_cap_bytes(), max(32 * 2**20, 2 * est)))
    return pl.pallas_call(
        _dense_kernel,
        out_shape=jax.ShapeDtypeStruct((M, N), _F32),
        grid=(M // rb, N // cb),
        in_specs=[pl.BlockSpec((rb, K), lambda i, j: (i, 0)),
                  pl.BlockSpec((K, cb), lambda i, j: (0, j)),
                  pl.BlockSpec((1, cb), lambda i, j: (0, j))],
        out_specs=pl.BlockSpec((rb, cb), lambda i, j: (i, j)),
        compiler_params=pltpu.CompilerParams(
            dimension_semantics=("parallel", "parallel"),
            vmem_limit_bytes=vmem),
    )(x, w, b)


# --------------------------- transformer layers kernel -----------------------

def _layer_norm(v, w, b, eps=1e-6):
    # eps=1e-6 matches the module's explicit nn.LayerNorm(..., eps=1e-06)
    mu = jnp.mean(v, axis=-1, keepdims=True)
    var = jnp.mean((v - mu) ** 2, axis=-1, keepdims=True)
    return (v - mu) * lax.rsqrt(var + eps) * w + b


def _transformer_layers_kernel(mask_ref, x0_ref, vecs_ref, bqkv_ref,
                               wqkv_ref, wo_ref, ffw_ref,
                               out_ref, x_all, *, num_heads):
    l = pl.program_id(0)
    t = pl.program_id(1)
    last_layer = pl.num_programs(0) - 1

    Bp, E = x0_ref.shape
    H = num_heads
    D = E // H

    # layer 0: seed the carried activation with this t's embedded input rows
    @pl.when(l == 0)
    def _():
        x_all[t] = x0_ref[...]

    x = x_all[t]                                         # (Bp, E) f32

    vecs = vecs_ref[0]                                   # (8, E) packed per-layer vectors
    ln1w, ln1b = vecs[0:1], vecs[1:2]
    bo = vecs[2:3]
    ln2w, ln2b = vecs[3:4], vecs[4:5]
    ffb = vecs[5:6]

    x1 = _layer_norm(x, ln1w, ln1b)

    # fused QKV projection; 1/sqrt(D) already folded into the Wq/bq columns
    qkv = jnp.dot(x1.astype(_BF16), wqkv_ref[0],
                  preferred_element_type=_F32) + bqkv_ref[0]

    # exact per-t attention over the (padded) batch axis; mask = user (B,B)
    # mask + key-padding mask, precomputed in the wrapper.
    amask = mask_ref[...]                                # (Bp, Bp)
    heads = []
    for h in range(H):                                   # H is small: keep unrolled
        lo = h * D
        qh = qkv[:, lo:lo + D].astype(_BF16)
        kh = qkv[:, E + lo:E + lo + D].astype(_BF16)
        vh = qkv[:, 2 * E + lo:2 * E + lo + D].astype(_BF16)
        s = lax.dot_general(qh, kh, (((1,), (1,)), ((), ())),
                            preferred_element_type=_F32)            # (Bp, Bp)
        s = s + amask
        s = s - jnp.max(s, axis=-1, keepdims=True)
        p = jnp.exp(s)
        p = p * pl.reciprocal(jnp.sum(p, axis=-1, keepdims=True), approx=True)
        heads.append(jnp.dot(p.astype(_BF16), vh,
                             preferred_element_type=_F32))          # (Bp, D)
    attn_in = jnp.concatenate(heads, axis=-1)            # (Bp, E) lane-dense

    attn = jnp.dot(attn_in.astype(_BF16), wo_ref[0],
                   preferred_element_type=_F32) + bo
    x = x + attn

    y = _layer_norm(x, ln2w, ln2b)
    # TODO(synk): dropout (attention probs + dropout_ff) is identity (eval mode).
    x = x + jnp.dot(y.astype(_BF16), ffw_ref[0],
                    preferred_element_type=_F32) + ffb
    x_all[t] = x

    @pl.when(l == last_layer)
    def _():
        out_ref[...] = x


# ----------------------------------- wrapper ---------------------------------

def pallas_transformer_forward(x, attn_mask, params, *, num_heads):
    B, T, E = x.shape
    V = params["ob"].shape[-1]
    layers = params["layers"]
    L = len(layers)
    H = num_heads
    D = E // H
    scale = 1.0 / math.sqrt(D)

    Bp = ((B + 7) // 8) * 8            # sublane-pad the attention-sequence axis
    Vp = ((V + 127) // 128) * 128      # lane-pad the vocab head

    # rows laid out r = t*Bp + b: each layer-kernel grid step handles one t
    xr = jnp.transpose(x, (1, 0, 2)).astype(_F32)        # (T, B, E)
    if Bp != B:
        xr = jnp.pad(xr, ((0, 0), (0, Bp - B), (0, 0)))
    xr = xr.reshape(T * Bp, E)

    # token + position embedding as a separate dense pallas_call.  The position
    # embedding (Linear(context_length->E) of arange(T)) is a single (E,)
    # vector added to every row, so it folds into the embedding bias.
    pos = (jnp.arange(T, dtype=_F32) @ params["pew"].astype(_F32)
           + params["peb"].astype(_F32))
    emb_bias = (params["teb"].astype(_F32) + pos).reshape(1, E)
    emb = _dense(xr, params["tew"].astype(_BF16), emb_bias)   # (T*Bp, E) f32

    # additive attention mask: user (B,B) mask + masked padded key columns
    maskp = jnp.full((Bp, Bp), -1e9, _F32)
    maskp = maskp.at[:, :B].set(0.0)
    maskp = maskp.at[:B, :B].set(attn_mask.astype(_F32))

    # per-layer weights stacked along a leading layer axis; tiny per-layer
    # vectors packed into a single (L, 8, E) tensor (one small DMA per layer).
    vecs = jnp.stack([
        jnp.stack([lp["ln1w"], lp["ln1b"], lp["bo"], lp["ln2w"], lp["ln2b"],
                   lp["ffb"], jnp.zeros((E,), _F32), jnp.zeros((E,), _F32)])
        for lp in layers]).astype(_F32)                            # (L, 8, E)
    bqkv = jnp.stack([
        jnp.concatenate([lp["bq"] * scale, lp["bk"], lp["bv"]]).reshape(1, -1)
        for lp in layers]).astype(_F32)                            # (L, 1, 3E)
    wqkv = jnp.stack([
        jnp.concatenate([lp["wq"] * scale, lp["wk"], lp["wv"]], axis=1)
        for lp in layers]).astype(_BF16)                           # (L, E, 3E)
    wo = jnp.stack([lp["wo"] for lp in layers]).astype(_BF16)      # (L, E, E)
    ffw = jnp.stack([lp["ffw"] for lp in layers]).astype(_BF16)    # (L, E, E)

    # VMEM budget: double-buffered blocks + carried activation scratch +
    # allowance for live intermediates (qkv, per-head scores), 2x headroom,
    # capped by this generation's usable VMEM.
    blocks = (Bp * Bp * 4 + Bp * E * 4 + 8 * E * 4 + 3 * E * 4
              + E * 3 * E * 2 + 2 * E * E * 2 + Bp * E * 4)
    est = 2 * blocks + T * Bp * E * 4 + 8 * Bp * 3 * E * 4 + H * Bp * Bp * 4
    vmem = int(min(_vmem_cap_bytes(), max(32 * 2**20, 2 * est)))

    layer_map = lambda l, t: (l, 0, 0)
    # embedded input is only consumed at layer 0; output blocks only swept at
    # the last layer -> index maps collapse to block 0 otherwise (no re-DMA /
    # no junk write-backs on the other layer steps).
    x0_map = lambda l, t: (jnp.where(l == 0, t, 0), 0)
    out_map = lambda l, t: (jnp.where(l == L - 1, t, 0), 0)

    hidden = pl.pallas_call(
        functools.partial(_transformer_layers_kernel, num_heads=H),
        out_shape=jax.ShapeDtypeStruct((T * Bp, E), _F32),
        grid=(L, T),                              # layers outer: weights stream exactly once
        in_specs=[
            pl.BlockSpec((Bp, Bp), lambda l, t: (0, 0)),   # additive mask
            pl.BlockSpec((Bp, E), x0_map),                 # embedded rows of t
            pl.BlockSpec((1, 8, E), layer_map),            # packed per-layer vectors
            pl.BlockSpec((1, 1, 3 * E), layer_map),        # fused qkv bias
            pl.BlockSpec((1, E, 3 * E), layer_map),        # fused Wqkv (bf16)
            pl.BlockSpec((1, E, E), layer_map),            # Wo (bf16)
            pl.BlockSpec((1, E, E), layer_map),            # FF W (bf16)
        ],
        out_specs=pl.BlockSpec((Bp, E), out_map),
        scratch_shapes=[pltpu.VMEM((T, Bp, E), _F32)],     # activations carried over layers
        compiler_params=pltpu.CompilerParams(
            dimension_semantics=("arbitrary", "arbitrary"),
            vmem_limit_bytes=vmem),
    )(maskp, emb, vecs, bqkv, wqkv, wo, ffw)

    # vocab head as a separate dense pallas_call (lane-padded to Vp), so the
    # head weight / logits never occupy VMEM during the layer pipeline.
    ow = jnp.zeros((E, Vp), _BF16).at[:, :V].set(params["ow"].astype(_BF16))
    ob = jnp.zeros((1, Vp), _F32).at[:, :V].set(
        params["ob"].reshape(1, -1).astype(_F32))
    logits = _dense(hidden, ow, ob)                        # (T*Bp, Vp)

    out = logits.reshape(T, Bp, Vp)[:, :B, :V].transpose(1, 0, 2)
    return out, []   # (logits, scores) — scores empty (return_attention_scores=False)


# ------------------------------ pure-JAX reference ---------------------------

def reference_forward(x, mask, params, *, num_heads):
    """Pure-JAX (f32) mirror of the PyTorch forward (batch_first=False MHA)."""
    B, T, E = x.shape
    H = num_heads
    D = E // H

    def ln(v, w, b):
        mu = v.mean(-1, keepdims=True)
        var = ((v - mu) ** 2).mean(-1, keepdims=True)
        return (v - mu) / jnp.sqrt(var + 1e-6) * w + b

    x = x @ params["tew"] + params["teb"]
    pos = jnp.arange(T, dtype=jnp.float32) @ params["pew"] + params["peb"]
    x = x + pos
    for lp in params["layers"]:
        x1 = ln(x, lp["ln1w"], lp["ln1b"])
        q = x1 @ lp["wq"] + lp["bq"]
        k = x1 @ lp["wk"] + lp["bk"]
        v = x1 @ lp["wv"] + lp["bv"]
        qh = q.reshape(B, T, H, D)
        kh = k.reshape(B, T, H, D)
        vh = v.reshape(B, T, H, D)
        # PyTorch MHA with batch_first=False: axis 0 (B) is the sequence axis
        s = jnp.einsum("ithd,jthd->thij", qh, kh) / jnp.sqrt(D) + mask[None, None]
        p = jax.nn.softmax(s, axis=-1)
        o = jnp.einsum("thij,jthd->ithd", p, vh).reshape(B, T, E)
        x = x + (o @ lp["wo"] + lp["bo"])
        y = ln(x, lp["ln2w"], lp["ln2b"])
        x = x + (y @ lp["ffw"] + lp["ffb"])
    return x @ params["ow"] + params["ob"]


def init_params(key, *, num_heads, vocab_size, context_length,
                token_embedding_size, num_layers):
    E = token_embedding_size

    def dense_p(k, n_in, n_out, scale=0.02):
        kw, kb = jax.random.split(k)
        w = scale * jax.random.normal(kw, (n_in, n_out), jnp.float32)  # stored (in, out)
        b = scale * jax.random.normal(kb, (n_out,), jnp.float32)
        return w, b

    keys = jax.random.split(key, 3 + num_layers)
    tew, teb = dense_p(keys[0], E, E)
    pew, peb = dense_p(keys[1], context_length, E)
    ow, ob = dense_p(keys[2], E, vocab_size)
    layers = []
    for l in range(num_layers):
        lk = jax.random.split(keys[3 + l], 9)
        wq, bq = dense_p(lk[0], E, E)
        wk, bk = dense_p(lk[1], E, E)
        wv, bv = dense_p(lk[2], E, E)
        wo, bo = dense_p(lk[3], E, E)
        ffw, ffb = dense_p(lk[4], E, E)
        ln1w = 1.0 + 0.01 * jax.random.normal(lk[5], (E,), jnp.float32)
        ln1b = 0.01 * jax.random.normal(lk[6], (E,), jnp.float32)
        ln2w = 1.0 + 0.01 * jax.random.normal(lk[7], (E,), jnp.float32)
        ln2b = 0.01 * jax.random.normal(lk[8], (E,), jnp.float32)
        layers.append(dict(ln1w=ln1w, ln1b=ln1b, wq=wq, bq=bq, wk=wk, bk=bk,
                           wv=wv, bv=bv, wo=wo, bo=bo, ln2w=ln2w, ln2b=ln2b,
                           ffw=ffw, ffb=ffb))
    return dict(tew=tew, teb=teb, pew=pew, peb=peb, ow=ow, ob=ob, layers=layers)


if __name__ == "__main__":
    # Small, module-consistent shapes:
    B, T = 2, 8               # batch, sequence (== context_length)
    E = 32                    # layer_size == token_embedding_size == feed_forward_size
    H = 4                     # num_heads (head_dim = 8)
    V = 16                    # vocab_size
    NUM_LAYERS = 2

    key = jax.random.PRNGKey(0)
    kx, kp = jax.random.split(key)
    x = jax.random.normal(kx, (B, T, E), jnp.float32)
    # attn_mask is (B, B): PyTorch MHA (batch_first=False) treats axis 0 of the
    # (B, T, E) input as the sequence axis.  Float additive mask.
    causal = jnp.tril(jnp.ones((B, B), jnp.float32))
    attn_mask = jnp.where(causal > 0, 0.0, -1e9).astype(jnp.float32)

    params = init_params(kp, num_heads=H, vocab_size=V, context_length=T,
                         token_embedding_size=E, num_layers=NUM_LAYERS)

    out, scores = pallas_transformer_forward(x, attn_mask, params, num_heads=H)
    out = jax.block_until_ready(out)

    ref = reference_forward(x, attn_mask, params, num_heads=H)
    assert out.shape == (B, T, V)
    err = float(jnp.max(jnp.abs(out - ref)))
    if not jnp.allclose(out, ref, rtol=2e-2, atol=2e-2):
        raise SystemExit("mismatch: max abs diff %e" % err)
    print("KERNEL_OK")
</pallas_src>

<mosaic_0001>
module attributes {stable_mosaic.version = 11 : i64} {
  func.func @_dense_kernel(%arg0: i32, %arg1: i32, %arg2: memref<64x32xf32, #tpu.memory_space<vmem>>, %arg3: memref<32x32xbf16, #tpu.memory_space<vmem>>, %arg4: memref<1x32xf32, #tpu.memory_space<vmem>>, %arg5: memref<64x32xf32, #tpu.memory_space<vmem>>) attributes {dimension_semantics = [#tpu.dimension_semantics<parallel>, #tpu.dimension_semantics<parallel>], iteration_bounds = array<i64: 1, 1>, scalar_prefetch = 0 : i64, scratch_operands = 0 : i64, tpu.core_type = #tpu.core_type<tc>, window_params = [{transform_indices = @transform_0, window_bounds = array<i64: 64, 32>}, {transform_indices = @transform_1, window_bounds = array<i64: 32, 32>}, {transform_indices = @transform_2, window_bounds = array<i64: 1, 32>}, {transform_indices = @transform_3, window_bounds = array<i64: 64, 32>}]} {
    %c0 = arith.constant 0 : index
    %c0_0 = arith.constant 0 : index
    %0 = vector.load %arg2[%c0, %c0_0] : memref<64x32xf32, #tpu.memory_space<vmem>>, vector<64x32xf32>
    %1 = arith.truncf %0 : vector<64x32xf32> to vector<64x32xbf16>
    %c0_1 = arith.constant 0 : index
    %c0_2 = arith.constant 0 : index
    %2 = vector.load %arg3[%c0_1, %c0_2] : memref<32x32xbf16, #tpu.memory_space<vmem>>, vector<32x32xbf16>
    %cst = arith.constant dense<0.000000e+00> : vector<64x32xf32>
    %3 = tpu.matmul %1, %2, %cst {dimension_numbers = #tpu.dot_dimension_numbers<[1], [0], [0], [1], [0, 0, 1, 1], [], []>} : vector<64x32xbf16>, vector<32x32xbf16>, vector<64x32xf32> -> vector<64x32xf32>
    %c0_3 = arith.constant 0 : index
    %c0_4 = arith.constant 0 : index
    %4 = vector.load %arg4[%c0_3, %c0_4] : memref<1x32xf32, #tpu.memory_space<vmem>>, vector<1x32xf32>
    %5 = vector.broadcast %4 : vector<1x32xf32> to vector<64x32xf32>
    %6 = arith.addf %3, %5 : vector<64x32xf32>
    %c0_5 = arith.constant 0 : index
    %c0_6 = arith.constant 0 : index
    %7 = vector.load %arg5[%c0_5, %c0_6] : memref<64x32xf32, #tpu.memory_space<vmem>>, vector<64x32xf32>
    tpu.vector_store %arg5[%c0_5, %c0_6], %6 {strides = array<i32>} : memref<64x32xf32, #tpu.memory_space<vmem>>, vector<64x32xf32>,
    return
  }
  func.func @transform_0(%arg0: i32, %arg1: i32) -> (i32, i32) {
    %c0_i32 = arith.constant 0 : i32
    %c0_i32_0 = arith.constant 0 : i32
    return %arg0, %c0_i32 : i32, i32
  }
  func.func @transform_1(%arg0: i32, %arg1: i32) -> (i32, i32) {
    %c0_i32 = arith.constant 0 : i32
    %c0_i32_0 = arith.constant 0 : i32
    return %c0_i32, %arg1 : i32, i32
  }
  func.func @transform_2(%arg0: i32, %arg1: i32) -> (i32, i32) {
    %c0_i32 = arith.constant 0 : i32
    %c0_i32_0 = arith.constant 0 : i32
    return %c0_i32, %arg1 : i32, i32
  }
  func.func @transform_3(%arg0: i32, %arg1: i32) -> (i32, i32) {
    %c0_i32 = arith.constant 0 : i32
    return %arg0, %arg1 : i32, i32
  }
}

</mosaic_0001>

<bundles_post_ra>
// kernel: tpu_custom_call.1
= control target key start
LH: loop header
LB: loop body
LE: loop exit
PB: predicated region body
PF: predicated region fallthrough
CT: control target
= control target key end

     0   :  { %vm47_vm0 = vcmask 261120   ;;  %s211_s1 = inlined_call_operand.vmem [shape: bf16[32,32], index: 1, kind: input, shape index: {}]   ;;  %s212_s0 = inlined_call_operand.vmem [shape: f32[64,32], index: 0, kind: input, shape index: {}]   ;;  %s213_s2 = inlined_call_operand.vmem [shape: f32[1,32], index: 2, kind: input, shape index: {}]   ;;  %s214_s3 = inlined_call_operand.vmem [shape: f32[64,32], index: 3, kind: output, shape index: {}]  }
   0x1   :  { %v114_v0 = vld [vmem:[%s211_s1 + $0x8] sm:$0xff]  ;;  %v113_v1 = vld [vmem:[%s211_s1] sm:$0xff]  ;;  %v17_v4 = vld [vmem:[%s212_s0 + $0x10] sm:$0xff] }
   0x2   :  { %v15_v2 = vld [vmem:[%s212_s0] sm:$0xff]  ;;  %v16_v3 = vld [vmem:[%s212_s0 + $0x8] sm:$0xff]  ;;  %66 = vmatpush.bf16.msra.mxu0 %v114_v0  ;;  %115 = vmatpush.bf16.msra.mxu1 %v114_v0  ;;  %v18_v5 = vld [vmem:[%s212_s0 + $0x18] sm:$0xff] }
   0x3   :  { %v19_v6 = vld [vmem:[%s212_s0 + $0x20] sm:$0xff]  ;;  %v20_v7 = vld [vmem:[%s212_s0 + $0x28] sm:$0xff]  ;;  %116 = vmatpush.bf16.msra.mxu2 %v114_v0  ;;  %117 = vmatpush.bf16.msra.mxu3 %v114_v0  ;;  %v21_v8 = vld [vmem:[%s212_s0 + $0x30] sm:$0xff]  ;;  %v23_v10 = vpack.c.bf16 %v16_v3, %v15_v2  ;;  %v24_v11 = vpack.c.bf16 %v18_v5, %v17_v4 }
   0x4   :  { %v22_v9 = vld [vmem:[%s212_s0 + $0x38] sm:$0xff]  ;;  %v25_v12 = vpack.c.bf16 %v20_v7, %v19_v6  ;;  %v121_v14 = vld [vmem:[%s213_s2] ss:$0 sm:$0xff] }
   0x5   :  { %v26_v13 = vpack.c.bf16 %v22_v9, %v21_v8 }
   0x6   :  { %67 = vmatpush.bf16.msra.mxu0 %v113_v1  ;;  %118 = vmatpush.bf16.msra.mxu1 %v113_v1 }
   0x7   :  { %119 = vmatpush.bf16.msra.mxu2 %v113_v1  ;;  %120 = vmatpush.bf16.msra.mxu3 %v113_v1 }
   0x9   :  { %109 = vmatmul.msk.bf16.vlgmr.msra.gmra.mxu0 %vm47_vm0, %v23_v10  ;;  %110 = vmatmul.msk.bf16.vlgmr.msra.gmra.mxu1 %vm47_vm0, %v24_v11 }
   0xa   :  { %111 = vmatmul.msk.bf16.vlgmr.msra.gmra.mxu2 %vm47_vm0, %v25_v12  ;;  %112 = vmatmul.msk.bf16.vlgmr.msra.gmra.mxu3 %vm47_vm0, %v26_v13 }
  0x86   :  { %v69_v15 = vpop.f32.mrf.mxu0  ;;  %v74_v16 = vpop.f32.mrf.mxu1 }
  0x87   :  { %v70_v17 = vadd.f32 %v121_v14, %v69_v15  ;;  %v75_v18 = vadd.f32 %v121_v14, %v74_v16 }
  0x89   :  { %89 = vst.msk [vmem:[%s214_s3] sm:$0xff] %vm47_vm0, %v70_v17 }
  0x8a   :  { %91 = vst.msk [vmem:[%s214_s3 + $0x10] sm:$0xff] %vm47_vm0, %v75_v18 }
  0x8d   :  { %v79_v19 = vpop.f32.mrf.mxu2  ;;  %v84_v20 = vpop.f32.mrf.mxu3 }
  0x8e   :  { %v80_v21 = vadd.f32 %v121_v14, %v79_v19  ;;  %v85_v22 = vadd.f32 %v121_v14, %v84_v20  ;;  %v71_v23 = vpop.f32.mrf.mxu0  ;;  %v76_v24 = vpop.f32.mrf.mxu1 }
  0x8f   :  { %v72_v25 = vadd.f32 %v121_v14, %v71_v23  ;;  %v77_v26 = vadd.f32 %v121_v14, %v76_v24 }
  0x90   :  { %93 = vst.msk [vmem:[%s214_s3 + $0x20] sm:$0xff] %vm47_vm0, %v80_v21 }
  0x91   :  { %95 = vst.msk [vmem:[%s214_s3 + $0x30] sm:$0xff] %vm47_vm0, %v85_v22 }
  0x92   :  { %90 = vst.msk [vmem:[%s214_s3 + $0x8] sm:$0xff] %vm47_vm0, %v72_v25 }
  0x93   :  { %92 = vst.msk [vmem:[%s214_s3 + $0x18] sm:$0xff] %vm47_vm0, %v77_v26 }
  0x95   :  { %v81_v27 = vpop.f32.mrf.mxu2  ;;  %v86_v28 = vpop.f32.mrf.mxu3 }
  0x96   :  { %v82_v29 = vadd.f32 %v121_v14, %v81_v27  ;;  %v87_v30 = vadd.f32 %v121_v14, %v86_v28 }
  0x98   :  { %94 = vst.msk [vmem:[%s214_s3 + $0x28] sm:$0xff] %vm47_vm0, %v82_v29 }
  0x99   :  { %96 = vst.msk [vmem:[%s214_s3 + $0x38] sm:$0xff] %vm47_vm0, %v87_v30 }

</bundles_post_ra>
